<compile_context>
chip_gen: v5e
topology: v5e:2x2
jax: 0.10.0
libtpu: 0.0.40
codegen_flags: <defaults>
</compile_context>

<pallas_src>
import jax
import jax.numpy as jnp
from jax.experimental import pallas as pl
from jax.experimental.pallas import tpu as pltpu


# ----------------------------------------------------------------------------
# Kernels
# ----------------------------------------------------------------------------
def _conv1x1_relu_lane_kernel(x_ref, w_ref, b_ref, o_ref):
    # x_ref: (C_in, l_tile)   one batch element's lane tile (batch dim squeezed)
    # w_ref: (H, C_in)        resident across the grid
    # b_ref: (H, 1)           resident across the grid
    # o_ref: (H, l_tile)
    y = jnp.dot(w_ref[...], x_ref[...], preferred_element_type=jnp.float32)
    y = y + b_ref[...]                       # (H, 1) broadcasts across lanes
    o_ref[...] = jnp.maximum(y, 0.0).astype(o_ref.dtype)


def _conv1x1_relu_batch_kernel(x_ref, w_ref, b_ref, o_ref):
    # x_ref: (NB, C_in, T)   a block of batch elements, full / large lane tile
    # w_ref: (H, C_in)       resident across the grid
    # b_ref: (H, 1)          resident across the grid
    # o_ref: (NB, H, T)
    NB, C_in, T = x_ref.shape
    H = w_ref.shape[0]
    x = x_ref[...]
    w = w_ref[...]
    # Unrolled VPU FMA chain over the tiny channel dim (C_in <= 16 guaranteed by
    # the tile picker).  Avoids any MXU / cross-sublane transpose for the 3-D
    # block; the op is HBM-bound so compute choice is noise anyway.
    acc = w[:, 0].reshape(1, H, 1) * x[:, 0, :].reshape(NB, 1, T)
    for c in range(1, C_in):
        acc = acc + w[:, c].reshape(1, H, 1) * x[:, c, :].reshape(NB, 1, T)
    acc = acc + b_ref[...].reshape(1, H, 1)
    o_ref[...] = jnp.maximum(acc, 0.0).astype(o_ref.dtype)


# ----------------------------------------------------------------------------
# Tile selection
# ----------------------------------------------------------------------------
def _largest_divisor_leq(n, cap):
    """Largest divisor of n that is <= cap (>= 1)."""
    cap = max(1, min(int(cap), int(n)))
    for cand in range(cap, 0, -1):
        if n % cand == 0:
            return cand
    return 1


def _pick_lane_tile(L, max_lane_tile):
    """Lane tile for the length axis: lane-dense and as large as the cap allows."""
    cap = min(max_lane_tile, L)
    start = cap - cap % 128
    # Prefer a multiple-of-128 divisor of L -> unmasked, full-width vector stores.
    for cand in range(start, 0, -128):
        if L % cand == 0:
            return cand
    if L <= max_lane_tile:
        return L  # whole length in one tile (may be <128 lanes for tiny L)
    # No usable divisor and L too long for one tile: lane-dense non-dividing tile;
    # the grid uses cdiv and Pallas masks the partial tail block (safe here: no
    # cross-position reduction, OOB lanes never contaminate valid lanes).
    return max(128, start)


def _pick_tiles(N, C_in, H, L, *, max_lane_tile, target_step_bytes):
    """Choose (NB, l_tile) so each grid step moves ~target_step_bytes of HBM traffic."""
    bytes_per_pos = (C_in + H) * 4  # one f32 read of C_in + one f32 write of H
    l_tile = _pick_lane_tile(L, max_lane_tile)

    NB = 1
    if l_tile == L and C_in <= 16:
        # Short-sequence regime: the whole length fits in one tile, so block over
        # batch to reach MB-scale DMAs and amortize the ~0.35us per-step overhead.
        nb_cap = max(1, target_step_bytes // max(1, bytes_per_pos * L))
        NB = _largest_divisor_leq(N, nb_cap)

    # v7x has 2 TensorCores: keep >=2 grid steps along the parallel axes, but only
    # when each half still moves >=~1 MiB (never shred a tiny workload for this).
    total_bytes = bytes_per_pos * N * L
    if (N // NB) * pl.cdiv(L, l_tile) < 2 and total_bytes >= 2 * (1 << 20):
        if NB > 1 and NB % 2 == 0:
            NB //= 2
        elif l_tile % 256 == 0:  # keep halves lane-dense (multiple of 128)
            l_tile //= 2
    return NB, l_tile


# ----------------------------------------------------------------------------
# Forward wrapper
# ----------------------------------------------------------------------------
def convolnet_forward(src, weight, bias, *,
                      max_lane_tile=16384, target_step_bytes=2 << 20):
    """src: (N, C_in, L) f32; weight: (H, C_in) f32; bias: (H,) f32.
    Returns (src, relu(conv1d(src))) with second element shaped (N, H, L)."""
    N, C_in, L = src.shape
    H = weight.shape[0]
    b_col = bias.reshape(H, 1)

    NB, l_tile = _pick_tiles(N, C_in, H, L,
                             max_lane_tile=max_lane_tile,
                             target_step_bytes=target_step_bytes)
    grid = (N // NB, pl.cdiv(L, l_tile))

    if NB == 1:
        kernel = _conv1x1_relu_lane_kernel
        x_spec = pl.BlockSpec((None, C_in, l_tile), lambda n, l: (n, 0, l))
        o_spec = pl.BlockSpec((None, H, l_tile), lambda n, l: (n, 0, l))
    else:
        kernel = _conv1x1_relu_batch_kernel
        x_spec = pl.BlockSpec((NB, C_in, l_tile), lambda n, l: (n, 0, l))
        o_spec = pl.BlockSpec((NB, H, l_tile), lambda n, l: (n, 0, l))

    cost = pl.CostEstimate(
        flops=2 * N * H * C_in * L,
        transcendentals=0,
        bytes_accessed=(C_in + H) * N * L * 4 + (H * C_in + H) * 4,
    )

    out = pl.pallas_call(
        kernel,
        out_shape=jax.ShapeDtypeStruct((N, H, L), src.dtype),
        grid_spec=pltpu.PrefetchScalarGridSpec(
            num_scalar_prefetch=0,
            grid=grid,
            in_specs=[
                x_spec,
                # Weight / bias: constant block index -> stay resident in VMEM.
                pl.BlockSpec((H, C_in), lambda n, l: (0, 0)),
                pl.BlockSpec((H, 1), lambda n, l: (0, 0)),
            ],
            out_specs=o_spec,
        ),
        compiler_params=pltpu.CompilerParams(
            # Both axes independent: shard across TensorCores on v7x megacore.
            dimension_semantics=("parallel", "parallel"),
        ),
        cost_estimate=cost,
    )(src, weight, b_col)

    # The module returns the input unchanged alongside the activation.
    return src, out


def _reference(src, weight, bias):
    return jnp.maximum(
        jnp.einsum("oc,ncl->nol", weight, src) + bias[None, :, None], 0.0
    )


if __name__ == "__main__":
    key = jax.random.PRNGKey(0)
    k_x, k_w, k_b, k_x2 = jax.random.split(key, 4)

    # Module-nominal small shapes: batch=2, in_dim=4, seq len=16, h_dim=32.
    N, C_in, L, H = 2, 4, 16, 32
    src = jax.random.normal(k_x, (N, C_in, L), dtype=jnp.float32)
    weight = jax.random.normal(k_w, (H, C_in), dtype=jnp.float32) * 0.1
    bias = jax.random.normal(k_b, (H,), dtype=jnp.float32) * 0.1

    # 1) Small-L regime -> batch-blocked kernel (NB=2, full-L tile, single step).
    src_out, y = convolnet_forward(src, weight, bias)
    jax.block_until_ready(y)
    assert y.shape == (N, H, L)
    assert src_out is src
    assert jnp.allclose(y, _reference(src, weight, bias), atol=1e-5, rtol=1e-5)

    # 2) Longer sequence, default tiling -> batch-blocked with l_tile = L = 2048.
    L2 = 2048
    src2 = jax.random.normal(k_x2, (N, C_in, L2), dtype=jnp.float32)
    _, y2 = convolnet_forward(src2, weight, bias)
    jax.block_until_ready(y2)
    assert y2.shape == (N, H, L2)
    assert jnp.allclose(y2, _reference(src2, weight, bias), atol=1e-5, rtol=1e-5)

    # 3) Force the lane-tiled MXU kernel (NB=1, grid (2, 4), 512-lane tiles) to
    #    exercise the pipelined long-sequence path at small test size.
    _, y3 = convolnet_forward(src2, weight, bias, max_lane_tile=512)
    jax.block_until_ready(y3)
    assert jnp.allclose(y3, _reference(src2, weight, bias), atol=1e-5, rtol=1e-5)

    print("KERNEL_OK")
</pallas_src>

<mosaic_0001>
module attributes {stable_mosaic.version = 11 : i64} {
  func.func @_conv1x1_relu_batch_kernel(%arg0: i32, %arg1: i32, %arg2: memref<2x4x16xf32, #tpu.memory_space<vmem>>, %arg3: memref<32x4xf32, #tpu.memory_space<vmem>>, %arg4: memref<32x1xf32, #tpu.memory_space<vmem>>, %arg5: memref<2x32x16xf32, #tpu.memory_space<vmem>>) attributes {dimension_semantics = [#tpu.dimension_semantics<parallel>, #tpu.dimension_semantics<parallel>], iteration_bounds = array<i64: 1, 1>, scalar_prefetch = 0 : i64, scratch_operands = 0 : i64, tpu.core_type = #tpu.core_type<tc>, window_params = [{transform_indices = @transform_0, window_bounds = array<i64: 2, 4, 16>}, {pipeline_mode = #tpu.pipeline_mode<synchronous>, transform_indices = @transform_1, window_bounds = array<i64: 32, 4>}, {pipeline_mode = #tpu.pipeline_mode<synchronous>, transform_indices = @transform_2, window_bounds = array<i64: 32, 1>}, {transform_indices = @transform_3, window_bounds = array<i64: 2, 32, 16>}]} {
    %c0 = arith.constant 0 : index
    %c0_0 = arith.constant 0 : index
    %c0_1 = arith.constant 0 : index
    %0 = vector.load %arg2[%c0, %c0_0, %c0_1] : memref<2x4x16xf32, #tpu.memory_space<vmem>>, vector<2x4x16xf32>
    %c0_2 = arith.constant 0 : index
    %c0_3 = arith.constant 0 : index
    %1 = vector.load %arg3[%c0_2, %c0_3] : memref<32x4xf32, #tpu.memory_space<vmem>>, vector<32x4xf32>
    %2 = vector.extract_strided_slice %1 {offsets = [0, 0], sizes = [32, 1], strides = [1, 1]} : vector<32x4xf32> to vector<32x1xf32>
    %3 = vector.shape_cast %2 : vector<32x1xf32> to vector<32xf32>
    %4 = vector.shape_cast %3 : vector<32xf32> to vector<1x32x1xf32>
    %5 = vector.extract_strided_slice %0 {offsets = [0, 0, 0], sizes = [2, 1, 16], strides = [1, 1, 1]} : vector<2x4x16xf32> to vector<2x1x16xf32>
    %6 = vector.shape_cast %5 : vector<2x1x16xf32> to vector<2x16xf32>
    %7 = vector.shape_cast %6 : vector<2x16xf32> to vector<2x1x16xf32>
    %8 = vector.broadcast %4 : vector<1x32x1xf32> to vector<2x32x16xf32>
    %9 = vector.broadcast %7 : vector<2x1x16xf32> to vector<2x32x16xf32>
    %10 = arith.mulf %8, %9 : vector<2x32x16xf32>
    %11 = vector.extract_strided_slice %1 {offsets = [0, 1], sizes = [32, 1], strides = [1, 1]} : vector<32x4xf32> to vector<32x1xf32>
    %12 = vector.shape_cast %11 : vector<32x1xf32> to vector<32xf32>
    %13 = vector.shape_cast %12 : vector<32xf32> to vector<1x32x1xf32>
    %14 = vector.extract_strided_slice %0 {offsets = [0, 1, 0], sizes = [2, 1, 16], strides = [1, 1, 1]} : vector<2x4x16xf32> to vector<2x1x16xf32>
    %15 = vector.shape_cast %14 : vector<2x1x16xf32> to vector<2x16xf32>
    %16 = vector.shape_cast %15 : vector<2x16xf32> to vector<2x1x16xf32>
    %17 = vector.broadcast %13 : vector<1x32x1xf32> to vector<2x32x16xf32>
    %18 = vector.broadcast %16 : vector<2x1x16xf32> to vector<2x32x16xf32>
    %19 = arith.mulf %17, %18 : vector<2x32x16xf32>
    %20 = arith.addf %10, %19 : vector<2x32x16xf32>
    %21 = vector.extract_strided_slice %1 {offsets = [0, 2], sizes = [32, 1], strides = [1, 1]} : vector<32x4xf32> to vector<32x1xf32>
    %22 = vector.shape_cast %21 : vector<32x1xf32> to vector<32xf32>
    %23 = vector.shape_cast %22 : vector<32xf32> to vector<1x32x1xf32>
    %24 = vector.extract_strided_slice %0 {offsets = [0, 2, 0], sizes = [2, 1, 16], strides = [1, 1, 1]} : vector<2x4x16xf32> to vector<2x1x16xf32>
    %25 = vector.shape_cast %24 : vector<2x1x16xf32> to vector<2x16xf32>
    %26 = vector.shape_cast %25 : vector<2x16xf32> to vector<2x1x16xf32>
    %27 = vector.broadcast %23 : vector<1x32x1xf32> to vector<2x32x16xf32>
    %28 = vector.broadcast %26 : vector<2x1x16xf32> to vector<2x32x16xf32>
    %29 = arith.mulf %27, %28 : vector<2x32x16xf32>
    %30 = arith.addf %20, %29 : vector<2x32x16xf32>
    %31 = vector.extract_strided_slice %1 {offsets = [0, 3], sizes = [32, 1], strides = [1, 1]} : vector<32x4xf32> to vector<32x1xf32>
    %32 = vector.shape_cast %31 : vector<32x1xf32> to vector<32xf32>
    %33 = vector.shape_cast %32 : vector<32xf32> to vector<1x32x1xf32>
    %34 = vector.extract_strided_slice %0 {offsets = [0, 3, 0], sizes = [2, 1, 16], strides = [1, 1, 1]} : vector<2x4x16xf32> to vector<2x1x16xf32>
    %35 = vector.shape_cast %34 : vector<2x1x16xf32> to vector<2x16xf32>
    %36 = vector.shape_cast %35 : vector<2x16xf32> to vector<2x1x16xf32>
    %37 = vector.broadcast %33 : vector<1x32x1xf32> to vector<2x32x16xf32>
    %38 = vector.broadcast %36 : vector<2x1x16xf32> to vector<2x32x16xf32>
    %39 = arith.mulf %37, %38 : vector<2x32x16xf32>
    %40 = arith.addf %30, %39 : vector<2x32x16xf32>
    %c0_4 = arith.constant 0 : index
    %c0_5 = arith.constant 0 : index
    %41 = vector.load %arg4[%c0_4, %c0_5] : memref<32x1xf32, #tpu.memory_space<vmem>>, vector<32x1xf32>
    %42 = vector.shape_cast %41 : vector<32x1xf32> to vector<1x32x1xf32>
    %43 = vector.broadcast %42 : vector<1x32x1xf32> to vector<2x32x16xf32>
    %44 = arith.addf %40, %43 : vector<2x32x16xf32>
    %cst = arith.constant 0.000000e+00 : f32
    %45 = vector.broadcast %cst : f32 to vector<2x32x16xf32>
    %46 = arith.maximumf %44, %45 : vector<2x32x16xf32>
    %c0_6 = arith.constant 0 : index
    %c0_7 = arith.constant 0 : index
    %c0_8 = arith.constant 0 : index
    %47 = vector.load %arg5[%c0_6, %c0_7, %c0_8] : memref<2x32x16xf32, #tpu.memory_space<vmem>>, vector<2x32x16xf32>
    tpu.vector_store %arg5[%c0_6, %c0_7, %c0_8], %46 {strides = array<i32>} : memref<2x32x16xf32, #tpu.memory_space<vmem>>, vector<2x32x16xf32>,
    return
  }
  func.func @transform_0(%arg0: i32, %arg1: i32) -> (i32, i32, i32) {
    %c0_i32 = arith.constant 0 : i32
    %c0_i32_0 = arith.constant 0 : i32
    return %arg0, %c0_i32, %arg1 : i32, i32, i32
  }
  func.func @transform_1(%arg0: i32, %arg1: i32) -> (i32, i32) {
    %c0_i32 = arith.constant 0 : i32
    %c0_i32_0 = arith.constant 0 : i32
    %c0_i32_1 = arith.constant 0 : i32
    return %c0_i32, %c0_i32_0 : i32, i32
  }
  func.func @transform_2(%arg0: i32, %arg1: i32) -> (i32, i32) {
    %c0_i32 = arith.constant 0 : i32
    %c0_i32_0 = arith.constant 0 : i32
    %c0_i32_1 = arith.constant 0 : i32
    return %c0_i32, %c0_i32_0 : i32, i32
  }
  func.func @transform_3(%arg0: i32, %arg1: i32) -> (i32, i32, i32) {
    %c0_i32 = arith.constant 0 : i32
    %c0_i32_0 = arith.constant 0 : i32
    return %arg0, %c0_i32, %arg1 : i32, i32, i32
  }
}

</mosaic_0001>

<bundles_post_ra>
// kernel: tpu_custom_call.1
= control target key start
LH: loop header
LB: loop body
LE: loop exit
PB: predicated region body
PF: predicated region fallthrough
CT: control target
= control target key end

     0   :  { %v221_v0 = vmov 1   ;;  %v222_v1 = vmov 0   ;;  %v223_v6 = vmov 2   ;;  %v224_v8 = vmov 3   ;;  %s343_s1 = inlined_call_operand.vmem [shape: f32[32,4], index: 1, kind: input, shape index: {}]   ;;  %s344_s2 = inlined_call_operand.vmem [shape: f32[32,1], index: 2, kind: input, shape index: {}]   ;;  %s345_s0 = inlined_call_operand.vmem [shape: f32[2,4,16], index: 0, kind: input, shape index: {}]   ;;  %s346_s3 = inlined_call_operand.vmem [shape: f32[2,32,16], index: 3, kind: output, shape index: {}]  }
   0x1   :  { %211 = vset.pattern.permute.xlu0 %v221_v0  ;;  %209 = vset.pattern.permute.xlu1 %v222_v1  ;;  %v18_v2 = vld [vmem:[%s343_s1 + $0x10] sm:$0xff]  ;;  %v16_v3 = vld [vmem:[%s343_s1] sm:$0xff]  ;;  %v19_v4 = vld [vmem:[%s343_s1 + $0x18] sm:$0xff]  ;;  %vm192_vm0 = vcmask 130048  }
   0x2   :  { %210 = vset.pattern.permute.xlu2 %v221_v0  ;;  %59 = vperm.xlu0 %211, %v18_v2   ;;  %v17_v5 = vld [vmem:[%s343_s1 + $0x8] sm:$0xff]  ;;  %v152_v7 = vld [vmem:[%s344_s2] sm:$0xff]  ;;  %v154_v10 = vld [vmem:[%s344_s2 + $0x10] sm:$0xff] }
   0x3   :  { %32 = vperm.xlu1 %209, %v18_v2   ;;  %51 = vperm.xlu2 %210, %v16_v3   ;;  %v153_v9 = vld [vmem:[%s344_s2 + $0x8] sm:$0xff]  ;;  %v155_v11 = vld [vmem:[%s344_s2 + $0x18] sm:$0xff]  ;;  %v14_v22 = vld [vmem:[%s345_s0] sm:$0xf] }
   0x4   :  { %v15_v23 = vld [vmem:[%s345_s0 + $0x4] sm:$0xf]  ;;  %v281_v24 = vperm.slane %v14_v22, 0  ;;  %v66_v28 = vperm.slane %v14_v22, 1  ;;  %v100_v35 = vperm.slane %v14_v22, 2  ;;  %v287_v41 = vperm.slane %v14_v22, 3 }
   0x5   :  { %v283_v25 = vperm.slane %v15_v23, 0  ;;  %v67_v29 = vperm.slane %v15_v23, 1  ;;  %v101_v36 = vperm.slane %v15_v23, 2  ;;  %v289_v42 = vperm.slane %v15_v23, 3 }
   0xa   :  { %215 = vset.pattern.permute.xlu0 %v223_v6 }
   0xb   :  { %37 = vperm.xlu1 %209, %v19_v4   ;;  %97 = vperm.xlu0 %215, %v19_v4  }
   0xc   :  { %55 = vperm.xlu2 %210, %v17_v5  }
  0x13   :  { %212 = vset.pattern.permute.xlu1 %v221_v0  ;;  %216 = vset.pattern.permute.xlu0 %v222_v1 }
  0x14   :  { %63 = vperm.xlu1 %212, %v19_v4   ;;  %213 = vset.pattern.permute.xlu2 %v223_v6 }
  0x15   :  { %22 = vperm.xlu0 %216, %v16_v3   ;;  %85 = vperm.xlu2 %213, %v16_v3  }
  0x1c   :  { %214 = vset.pattern.permute.xlu1 %v223_v6 }
  0x1d   :  { %89 = vperm.xlu1 %214, %v17_v5   ;;  %27 = vperm.xlu0 %216, %v17_v5  }
  0x1e   :  { %93 = vperm.xlu2 %213, %v18_v2  }
  0x25   :  { %217 = vset.pattern.permute.xlu1 %v224_v8  ;;  %158 = vperm.xlu0 %216, %v152_v7  }
  0x26   :  { %119 = vperm.xlu1 %217, %v16_v3   ;;  %218 = vset.pattern.permute.xlu2 %v224_v8 }
  0x27   :  { %123 = vperm.xlu2 %218, %v17_v5  }
  0x2e   :  { %127 = vperm.xlu1 %217, %v18_v2  }
  0x2f   :  { %131 = vperm.xlu2 %218, %v19_v4  }
  0x36   :  { %219 = vset.pattern.permute.xlu1 %v222_v1 }
  0x37   :  { %163 = vperm.xlu1 %219, %v153_v9   ;;  %220 = vset.pattern.permute.xlu2 %v222_v1 }
  0x38   :  { %168 = vperm.xlu2 %220, %v154_v10  }
  0x3f   :  { %173 = vperm.xlu1 %219, %v155_v11  }
  0x5d   :  { %v52_v12 = vpop.permute.xlu2 %51 }
  0x5e   :  { %v68_v33 = vmul.f32 %v66_v28, %v52_v12  ;;  %v72_v34 = vmul.f32 %v67_v29, %v52_v12 }
  0x66   :  { %v56_v13 = vpop.permute.xlu2 %55 }
  0x67   :  { %v69_v0 = vmul.f32 %v66_v28, %v56_v13  ;;  %v73_v1 = vmul.f32 %v67_v29, %v56_v13 }
  0x6f   :  { %v86_v17 = vpop.permute.xlu2 %85 }
  0x70   :  { %v102_v37 = vmul.f32 %v100_v35, %v86_v17  ;;  %v106_v38 = vmul.f32 %v101_v36, %v86_v17 }
  0x74   :  { %v60_v15 = vpop.permute.xlu0 %59 }
  0x75   :  { %v33_v14 = vpop.permute.xlu1 %32  ;;  %v70_v43 = vmul.f32 %v66_v28, %v60_v15  ;;  %v74_v44 = vmul.f32 %v67_v29, %v60_v15 }
  0x76   :  { %v44_v45 = vmul.f32 %v281_v24, %v33_v14  ;;  %v48_v46 = vmul.f32 %v283_v25, %v33_v14 }
  0x78   :  { %v94_v20 = vpop.permute.xlu2 %93  ;;  %v78_v56 = vadd.f32 %v70_v43, %v44_v45  ;;  %v82_v57 = vadd.f32 %v74_v44, %v48_v46 }
  0x79   :  { %v104_v60 = vmul.f32 %v100_v35, %v94_v20  ;;  %v108_v61 = vmul.f32 %v101_v36, %v94_v20 }
  0x7b   :  { %v112_v7 = vadd.f32 %v104_v60, %v78_v56  ;;  %v116_v8 = vadd.f32 %v108_v61, %v82_v57 }
  0x7d   :  { %v269_v16 = vpop.permute.xlu1 %37  ;;  %v271_v18 = vpop.permute.xlu0 %97 }
  0x81   :  { %v124_v27 = vpop.permute.xlu2 %123 }
  0x82   :  { %v137_v14 = vmul.f32 %v287_v41, %v124_v27  ;;  %v141_v15 = vmul.f32 %v289_v42, %v124_v27  ;;  %v109_v27 = vmul.f32 %v101_v36, %v271_v18 }
  0x86   :  { %v273_v19 = vpop.permute.xlu1 %63 }
  0x87   :  { %v23_v21 = vpop.permute.xlu0 %22  ;;  %v75_v22 = vmul.f32 %v67_v29, %v273_v19 }
  0x88   :  { %v42_v30 = vmul.f32 %v281_v24, %v23_v21  ;;  %v46_v31 = vmul.f32 %v283_v25, %v23_v21  ;;  %v71_v21 = vmul.f32 %v66_v28, %v273_v19 }
  0x89   :  { %v132_v52 = vpop.permute.xlu2 %131 }
  0x8a   :  { %v76_v39 = vadd.f32 %v68_v33, %v42_v30  ;;  %v80_v40 = vadd.f32 %v72_v34, %v46_v31  ;;  %v49_v33 = vmul.f32 %v283_v25, %v269_v16  ;;  %v105_v34 = vmul.f32 %v100_v35, %v271_v18 }
  0x8b   :  { %v139_v18 = vmul.f32 %v287_v41, %v132_v52 }
  0x8c   :  { %v110_v50 = vadd.f32 %v102_v37, %v76_v39  ;;  %v114_v51 = vadd.f32 %v106_v38, %v80_v40  ;;  %v83_v28 = vadd.f32 %v75_v22, %v49_v33 }
  0x8e   :  { %v117_v44 = vadd.f32 %v109_v27, %v83_v28 }
  0x8f   :  { %v90_v26 = vpop.permute.xlu1 %89  ;;  %v28_v32 = vpop.permute.xlu0 %27 }
  0x90   :  { %v43_v58 = vmul.f32 %v281_v24, %v28_v32  ;;  %v47_v59 = vmul.f32 %v283_v25, %v28_v32  ;;  %v103_v11 = vmul.f32 %v100_v35, %v90_v26  ;;  %v107_v12 = vmul.f32 %v101_v36, %v90_v26 }
  0x91   :  { %v45_v32 = vmul.f32 %v281_v24, %v269_v16  ;;  %v143_v25 = vmul.f32 %v289_v42, %v132_v52 }
  0x92   :  { %v77_v4 = vadd.f32 %v69_v0, %v43_v58  ;;  %v81_v5 = vadd.f32 %v73_v1, %v47_v59  ;;  %v169_v13 = vpop.permute.xlu2 %168 }
  0x93   :  { %v79_v39 = vadd.f32 %v71_v21, %v45_v32  ;;  %v151_v46 = vadd.f32 %v143_v25, %v117_v44 }
  0x94   :  { %v111_v23 = vadd.f32 %v103_v11, %v77_v4  ;;  %v115_v30 = vadd.f32 %v107_v12, %v81_v5 }
  0x95   :  { %v113_v43 = vadd.f32 %v105_v34, %v79_v39 }
  0x96   :  { %v145_v40 = vadd.f32 %v137_v14, %v111_v23  ;;  %v149_v19 = vadd.f32 %v141_v15, %v115_v30 }
  0x97   :  { %v159_v53 = vpop.permute.xlu0 %158  ;;  %v147_v45 = vadd.f32 %v139_v18, %v113_v43 }
  0x98   :  { %v120_v47 = vpop.permute.xlu1 %119 }
  0x99   :  { %v136_v48 = vmul.f32 %v287_v41, %v120_v47  ;;  %v140_v49 = vmul.f32 %v289_v42, %v120_v47 }
  0x9b   :  { %v144_v54 = vadd.f32 %v136_v48, %v110_v50  ;;  %v148_v55 = vadd.f32 %v140_v49, %v114_v51 }
  0x9d   :  { %v176_v62 = vadd.f32 %v159_v53, %v144_v54  ;;  %v180_v63 = vadd.f32 %v159_v53, %v148_v55 }
  0x9f   :  { %v184_v2 = vmax.f32 %v176_v62, 0.0  ;;  %v188_v3 = vmax.f32 %v180_v63, 0.0 }
  0xa0   :  { %v128_v6 = vpop.permute.xlu1 %127 }
  0xa1   :  { %193 = vst.msk [vmem:[%s346_s3] sm:$0xff] %vm192_vm0, %v184_v2  ;;  %v138_v9 = vmul.f32 %v287_v41, %v128_v6  ;;  %v142_v10 = vmul.f32 %v289_v42, %v128_v6 }
  0xa2   :  { %197 = vst.msk [vmem:[%s346_s3 + $0x20] sm:$0xff] %vm192_vm0, %v188_v3 }
  0xa3   :  { %v146_v17 = vadd.f32 %v138_v9, %v112_v7  ;;  %v150_v20 = vadd.f32 %v142_v10, %v116_v8 }
  0xa5   :  { %v178_v31 = vadd.f32 %v169_v13, %v146_v17  ;;  %v182_v26 = vadd.f32 %v169_v13, %v150_v20 }
  0xa7   :  { %v186_v37 = vmax.f32 %v178_v31, 0.0  ;;  %v190_v38 = vmax.f32 %v182_v26, 0.0 }
  0xa9   :  { %195 = vst.msk [vmem:[%s346_s3 + $0x10] sm:$0xff] %vm192_vm0, %v186_v37  ;;  %v164_v29 = vpop.permute.xlu1 %163 }
  0xaa   :  { %199 = vst.msk [vmem:[%s346_s3 + $0x30] sm:$0xff] %vm192_vm0, %v190_v38  ;;  %v177_v16 = vadd.f32 %v164_v29, %v145_v40  ;;  %v181_v24 = vadd.f32 %v164_v29, %v149_v19 }
  0xac   :  { %v185_v35 = vmax.f32 %v177_v16, 0.0  ;;  %v189_v36 = vmax.f32 %v181_v24, 0.0 }
  0xae   :  { %194 = vst.msk [vmem:[%s346_s3 + $0x8] sm:$0xff] %vm192_vm0, %v185_v35 }
  0xaf   :  { %198 = vst.msk [vmem:[%s346_s3 + $0x28] sm:$0xff] %vm192_vm0, %v189_v36 }
  0xb1   :  { %v174_v47 = vpop.permute.xlu1 %173 }
  0xb2   :  { %v179_v41 = vadd.f32 %v174_v47, %v147_v45  ;;  %v183_v48 = vadd.f32 %v174_v47, %v151_v46 }
  0xb4   :  { %v187_v42 = vmax.f32 %v179_v41, 0.0  ;;  %v191_v49 = vmax.f32 %v183_v48, 0.0 }
  0xb6   :  { %196 = vst.msk [vmem:[%s346_s3 + $0x18] sm:$0xff] %vm192_vm0, %v187_v42 }
  0xb7   :  { %200 = vst.msk [vmem:[%s346_s3 + $0x38] sm:$0xff] %vm192_vm0, %v191_v49 }

</bundles_post_ra>
